<compile_context>
chip_gen: v7x
topology: tpu7x:2x2x1
jax: 0.10.0
libtpu: 0.0.40
codegen_flags: <defaults>
</compile_context>

<pallas_src>
import jax
import jax.numpy as jnp
from jax import lax
from jax.experimental import pallas as pl
from jax.experimental.pallas import tpu as pltpu

# ---- small, self-consistent config (stand-in for 3 x 75 x 150 images) ----
IMAGE_CHANNELS = 3
IMAGE_HEIGHT = 8          # stand-in for 75
IMAGE_WIDTH = 16          # stand-in for 150
EXTRA_FEATURES = 3
NEG_SLOPE = 0.01          # F.leaky_relu default negative_slope

C0, C1, C2 = IMAGE_CHANNELS, 6, 16
KH = KW = 3
TAPS = KH * KW
K1 = TAPS * C0            # 27: stacked-K for conv1
K2 = TAPS * C1            # 54: stacked-K for conv2

# spatial geometry (valid conv, kernel 3, stride 1; maxpool 2 with floor)
HIN, WIN = 2 * IMAGE_HEIGHT, IMAGE_WIDTH            # eyes stacked along H -> (16, 16)
N0 = HIN * WIN                                      # 256 flattened input columns
H1, W1 = HIN - 2, WIN - 2                           # after conv1: 14, 14
H1P, W1P = H1 // 2, W1 // 2                         # after pool1: 7, 7
H2, W2 = H1P - 2, W1P - 2                           # after conv2: 5, 5
H2P, W2P = H2 // 2, W2 // 2                         # after pool2: 2, 2
FLAT = H2P * W2P                                    # width of x.view(-1, H*W) -> 4
ROWS = C2 + EXTRA_FEATURES                          # rows entering the MLP -> 19

# flattened-grid extents (channels on sublanes, flat y*WIN+x on lanes).
# Pool1's stride-2 decimation is deferred: conv2/pool2 index the undecimated
# grid with offsets dilated by 2, so column c = 32m+2n carries conv2 output
# (m, n) and column 64p+4q carries pool2 output (p, q).
M2 = 104                  # conv2 columns computed; max needed index = 68+34 = 102
T1W = 172                 # pool1 4-way-max columns; max read by conv2 = 103+68 = 171
M1 = 192                  # conv1 columns computed; max read by pool1 = 171+17 = 188
T2W = 69                  # pool2 4-way-max columns; max picked column = 68
assert M2 - 1 + 2 * WIN + 2 <= T1W <= M1 - WIN - 1 and M1 - 1 + 2 * WIN + 2 <= N0

N_FC1, N_FC2, N_OUT = 120, 84, 2

# packed conv-param slab layout: (C2, CONV_COLS)
B1_COL = K1               # 27
W2S_COL = 128             # lane-aligned start for conv2 weights
B2_COL = W2S_COL + K2     # 182
CONV_COLS = B2_COL + 1    # 183

# packed fc-param slab layout: (FC_ROWS, FC_COLS), 128-aligned column regions
FC2_COL, FC1_COL, FC3_COL = 0, 128, 256
FC_ROWS = N_FC1 + 1       # 121 (bias rows sit under each weight block)
FC_COLS = FC3_COL + N_OUT # 258


# -------------------- fused Pallas kernel (one grid step = one sample) --------------------

def _convnet_fused_kernel(x_ref, feat_ref, cp_ref, fp_ref, out_ref,
                          st1_ref, st2_ref, xmlp_ref):
    x = x_ref[...]                                   # (C0, 256): both eyes, H-concat flattened

    # ---- conv1 (3x3 valid) as ONE matmul: stack the 9 shifted slabs on sublanes.
    for dy in range(KH):
        for dx in range(KW):
            k = dy * KW + dx
            off = dy * WIN + dx
            st1_ref[k * C0:(k + 1) * C0, :] = x[:, off:off + M1]
    z1 = jnp.dot(cp_ref[0:C1, 0:K1], st1_ref[...], preferred_element_type=jnp.float32)
    z1 = z1 + cp_ref[0:C1, B1_COL:B1_COL + 1]
    z1 = jnp.where(z1 > 0, z1, NEG_SLOPE * z1)

    # ---- max_pool2d 2x2: 4-way max only; stride-2 decimation deferred (no selection
    #      matmul, no strided reads).  Pool1 output (i,j) lives at column 2i*WIN+2j.
    t1 = jnp.maximum(jnp.maximum(z1[:, 0:T1W], z1[:, 1:T1W + 1]),
                     jnp.maximum(z1[:, WIN:WIN + T1W], z1[:, WIN + 1:WIN + 1 + T1W]))

    # ---- conv2 (3x3 valid) as ONE matmul on the undecimated grid: taps dilated by 2.
    for dy in range(KH):
        for dx in range(KW):
            k = dy * KW + dx
            off = 2 * dy * WIN + 2 * dx
            st2_ref[k * C1:(k + 1) * C1, :] = t1[:, off:off + M2]
    z2 = jnp.dot(cp_ref[0:C2, W2S_COL:W2S_COL + K2], st2_ref[...],
                 preferred_element_type=jnp.float32)
    z2 = z2 + cp_ref[0:C2, B2_COL:B2_COL + 1]
    z2 = jnp.where(z2 > 0, z2, NEG_SLOPE * z2)

    # ---- max_pool2d 2x2 (dilated shifts {0,2,32,34}) + x.view(-1, H*W): pick the 4
    #      valid columns straight into CHW-flatten order, then cat(features, dim=0).
    t2 = jnp.maximum(jnp.maximum(z2[:, 0:T2W], z2[:, 2:T2W + 2]),
                     jnp.maximum(z2[:, 2 * WIN:2 * WIN + T2W],
                                 z2[:, 2 * WIN + 2:2 * WIN + 2 + T2W]))
    for p in range(H2P):
        for q in range(W2P):
            col = 4 * WIN * p + 4 * q                # pool2 output (p, q)
            j = p * W2P + q
            xmlp_ref[0:C2, j:j + 1] = t2[:, col:col + 1]
    xmlp_ref[C2:ROWS, :] = feat_ref[...]

    # ---- fc1/relu -> fc2/relu -> fc3 (weights sliced from the packed fc slab)
    xm = xmlp_ref[...]
    h = jnp.dot(xm, fp_ref[0:FLAT, FC1_COL:FC1_COL + N_FC1],
                preferred_element_type=jnp.float32)
    h = jnp.maximum(h + fp_ref[FLAT:FLAT + 1, FC1_COL:FC1_COL + N_FC1], 0.0)
    h = jnp.dot(h, fp_ref[0:N_FC1, FC2_COL:FC2_COL + N_FC2],
                preferred_element_type=jnp.float32)
    h = jnp.maximum(h + fp_ref[N_FC1:N_FC1 + 1, FC2_COL:FC2_COL + N_FC2], 0.0)
    out_ref[...] = (jnp.dot(h, fp_ref[0:N_FC2, FC3_COL:FC3_COL + N_OUT],
                            preferred_element_type=jnp.float32)
                    + fp_ref[N_FC2:N_FC2 + 1, FC3_COL:FC3_COL + N_OUT])


# -------------------- parameter prep (hoisted, runs once) --------------------

def prepare_params(params):
    """Pack all parameters into two lane-dense f32 slabs (runs once, not per step)."""
    # stacked conv weights: row c_out, column (dy*KW+dx)*Cin + c_in
    w1s = jnp.transpose(params["conv1_w"], (0, 2, 3, 1)).reshape(C1, K1)
    w2s = jnp.transpose(params["conv2_w"], (0, 2, 3, 1)).reshape(C2, K2)
    conv = jnp.zeros((C2, CONV_COLS), jnp.float32)
    conv = conv.at[0:C1, 0:K1].set(w1s)
    conv = conv.at[0:C1, B1_COL:B1_COL + 1].set(params["conv1_b"].reshape(C1, 1))
    conv = conv.at[0:C2, W2S_COL:W2S_COL + K2].set(w2s)
    conv = conv.at[0:C2, B2_COL:B2_COL + 1].set(params["conv2_b"].reshape(C2, 1))

    fc = jnp.zeros((FC_ROWS, FC_COLS), jnp.float32)
    fc = fc.at[0:N_FC1, FC2_COL:FC2_COL + N_FC2].set(params["fc2_w"].T)
    fc = fc.at[N_FC1, FC2_COL:FC2_COL + N_FC2].set(params["fc2_b"])
    fc = fc.at[0:FLAT, FC1_COL:FC1_COL + N_FC1].set(params["fc1_w"].T)
    fc = fc.at[FLAT, FC1_COL:FC1_COL + N_FC1].set(params["fc1_b"])
    fc = fc.at[0:N_FC2, FC3_COL:FC3_COL + N_OUT].set(params["fc3_w"].T)
    fc = fc.at[N_FC2, FC3_COL:FC3_COL + N_OUT].set(params["fc3_b"])
    return {"conv": conv, "fc": fc}


# -------------------- forward (batched: grid axis over samples) --------------------

def convnet_forward(prepped, eye_left, eye_right, features):
    """Per-sample ConvNet.forward applied to a batch via a parallel grid axis."""
    B = eye_left.shape[0]
    # torch.cat([eye_left, eye_right], dim=1) on CHW == concat along H; the flatten
    # to (C, H*W) is free layout plumbing so each sample is one lane-dense slab.
    x = jnp.concatenate([eye_left, eye_right], axis=2).reshape(B, C0, N0)

    grid_spec = pltpu.PrefetchScalarGridSpec(
        num_scalar_prefetch=0,
        grid=(B,),
        in_specs=[
            pl.BlockSpec((None, C0, N0), lambda b: (b, 0, 0)),                  # x (streams)
            pl.BlockSpec((None, EXTRA_FEATURES, FLAT), lambda b: (b, 0, 0)),    # features
            pl.BlockSpec((C2, CONV_COLS), lambda b: (0, 0)),                    # conv params (resident)
            pl.BlockSpec((FC_ROWS, FC_COLS), lambda b: (0, 0)),                 # fc params (resident)
        ],
        out_specs=pl.BlockSpec((None, ROWS, N_OUT), lambda b: (b, 0, 0)),
        scratch_shapes=[
            pltpu.VMEM((K1, M1), jnp.float32),      # conv1 stacked-tap slab
            pltpu.VMEM((K2, M2), jnp.float32),      # conv2 stacked-tap slab
            pltpu.VMEM((ROWS, FLAT), jnp.float32),  # MLP input (conv rows + feature rows)
        ],
    )
    return pl.pallas_call(
        _convnet_fused_kernel,
        out_shape=jax.ShapeDtypeStruct((B, ROWS, N_OUT), jnp.float32),
        grid_spec=grid_spec,
        compiler_params=pltpu.CompilerParams(dimension_semantics=("parallel",)),
    )(x, features, prepped["conv"], prepped["fc"])


# -------------------- pure-JAX reference (for a correctness check) --------------------

def reference_forward(params, eye_left, eye_right, features):
    def conv(x, w, b):
        y = lax.conv_general_dilated(x, w, (1, 1), "VALID",
                                     dimension_numbers=("NCHW", "OIHW", "NCHW"))
        return y + b[None, :, None, None]

    def pool(x):
        return lax.reduce_window(x, -jnp.inf, lax.max,
                                 (1, 1, 2, 2), (1, 1, 2, 2), "VALID")

    def leaky(x):
        return jnp.where(x > 0, x, NEG_SLOPE * x)

    def single(el, er, feat):
        x = jnp.concatenate([el, er], axis=1)[None]                 # (1, 3, 2H, W)
        x = pool(leaky(conv(x, params["conv1_w"], params["conv1_b"])))
        x = pool(leaky(conv(x, params["conv2_w"], params["conv2_b"])))
        x = x[0].reshape(C2, -1)                                    # view(-1, H*W)
        x = jnp.concatenate([x, feat], axis=0)                      # cat(dim=0)
        x = jnp.maximum(x @ params["fc1_w"].T + params["fc1_b"], 0.0)
        x = jnp.maximum(x @ params["fc2_w"].T + params["fc2_b"], 0.0)
        return x @ params["fc3_w"].T + params["fc3_b"]

    return jnp.stack([single(eye_left[i], eye_right[i], features[i])
                      for i in range(eye_left.shape[0])])


# -------------------- init --------------------

def init_params(key):
    ks = jax.random.split(key, 10)

    def u(k, shape, fan_in):
        bound = fan_in ** -0.5
        return jax.random.uniform(k, shape, jnp.float32, -bound, bound)

    return {
        # conv weights in PyTorch OIHW layout
        "conv1_w": u(ks[0], (C1, C0, KH, KW), C0 * KH * KW),
        "conv1_b": u(ks[1], (C1,), C0 * KH * KW),
        "conv2_w": u(ks[2], (C2, C1, KH, KW), C1 * KH * KW),
        "conv2_b": u(ks[3], (C2,), C1 * KH * KW),
        # fc weights in PyTorch (out, in) layout
        "fc1_w": u(ks[4], (N_FC1, FLAT), FLAT),
        "fc1_b": u(ks[5], (N_FC1,), FLAT),
        "fc2_w": u(ks[6], (N_FC2, N_FC1), N_FC1),
        "fc2_b": u(ks[7], (N_FC2,), N_FC1),
        "fc3_w": u(ks[8], (N_OUT, N_FC2), N_FC2),
        "fc3_b": u(ks[9], (N_OUT,), N_FC2),
    }


if __name__ == "__main__":
    key = jax.random.PRNGKey(0)
    kp, kl, kr, kf = jax.random.split(key, 4)
    params = init_params(kp)
    prepped = prepare_params(params)   # layout prep hoisted out of the forward

    B = 4
    eye_left = jax.random.normal(kl, (B, C0, IMAGE_HEIGHT, IMAGE_WIDTH), jnp.float32)
    eye_right = jax.random.normal(kr, (B, C0, IMAGE_HEIGHT, IMAGE_WIDTH), jnp.float32)
    # features are concatenated as extra rows (dim=0), so they share the flattened width
    features = jax.random.normal(kf, (B, EXTRA_FEATURES, FLAT), jnp.float32)

    out = jax.jit(convnet_forward)(prepped, eye_left, eye_right, features)
    jax.block_until_ready(out)
    assert out.shape == (B, ROWS, N_OUT), out.shape
    assert bool(jnp.all(jnp.isfinite(out)))

    # Note: kernel dots run at default MXU precision (like the XLA reference), so the
    # comparison uses a loose tolerance; pass precision=HIGHEST if exact parity matters.
    ref = reference_forward(params, eye_left, eye_right, features)
    assert bool(jnp.allclose(out, ref, rtol=5e-2, atol=5e-2)), (out, ref)

    print("KERNEL_OK")
</pallas_src>

<mosaic_0001>
module attributes {stable_mosaic.version = 11 : i64} {
  func.func @_convnet_fused_kernel(%arg0: i32, %arg1: memref<1x3x256xf32, #tpu.memory_space<vmem>>, %arg2: memref<1x3x4xf32, #tpu.memory_space<vmem>>, %arg3: memref<16x183xf32, #tpu.memory_space<vmem>>, %arg4: memref<121x258xf32, #tpu.memory_space<vmem>>, %arg5: memref<1x19x2xf32, #tpu.memory_space<vmem>>, %arg6: memref<27x192xf32, #tpu.memory_space<vmem>>, %arg7: memref<54x104xf32, #tpu.memory_space<vmem>>, %arg8: memref<19x4xf32, #tpu.memory_space<vmem>>) attributes {dimension_semantics = [#tpu.dimension_semantics<parallel>], iteration_bounds = array<i64: 4>, scalar_prefetch = 0 : i64, scratch_operands = 3 : i64, tpu.core_type = #tpu.core_type<tc>, window_params = [{transform_indices = @transform_0, window_bounds = array<i64: 1, 3, 256>}, {transform_indices = @transform_1, window_bounds = array<i64: 1, 3, 4>}, {pipeline_mode = #tpu.pipeline_mode<synchronous>, transform_indices = @transform_2, window_bounds = array<i64: 16, 183>}, {pipeline_mode = #tpu.pipeline_mode<synchronous>, transform_indices = @transform_3, window_bounds = array<i64: 121, 258>}, {transform_indices = @transform_4, window_bounds = array<i64: 1, 19, 2>}]} {
    %c0 = arith.constant 0 : index
    %c0_0 = arith.constant 0 : index
    %c0_1 = arith.constant 0 : index
    %0 = vector.load %arg1[%c0, %c0_0, %c0_1] : memref<1x3x256xf32, #tpu.memory_space<vmem>>, vector<1x3x256xf32>
    %1 = vector.shape_cast %0 : vector<1x3x256xf32> to vector<3x256xf32>
    %2 = vector.extract_strided_slice %1 {offsets = [0, 0], sizes = [3, 192], strides = [1, 1]} : vector<3x256xf32> to vector<3x192xf32>
    %c0_2 = arith.constant 0 : index
    %c0_3 = arith.constant 0 : index
    %3 = vector.load %arg6[%c0_2, %c0_3] : memref<27x192xf32, #tpu.memory_space<vmem>>, vector<3x192xf32>
    tpu.vector_store %arg6[%c0_2, %c0_3], %2 {strides = array<i32>} : memref<27x192xf32, #tpu.memory_space<vmem>>, vector<3x192xf32>,
    %4 = vector.extract_strided_slice %1 {offsets = [0, 1], sizes = [3, 192], strides = [1, 1]} : vector<3x256xf32> to vector<3x192xf32>
    %c3 = arith.constant 3 : index
    %c0_4 = arith.constant 0 : index
    %5 = vector.load %arg6[%c3, %c0_4] : memref<27x192xf32, #tpu.memory_space<vmem>>, vector<3x192xf32>
    tpu.vector_store %arg6[%c3, %c0_4], %4 {strides = array<i32>} : memref<27x192xf32, #tpu.memory_space<vmem>>, vector<3x192xf32>,
    %6 = vector.extract_strided_slice %1 {offsets = [0, 2], sizes = [3, 192], strides = [1, 1]} : vector<3x256xf32> to vector<3x192xf32>
    %c6 = arith.constant 6 : index
    %c0_5 = arith.constant 0 : index
    %7 = vector.load %arg6[%c6, %c0_5] : memref<27x192xf32, #tpu.memory_space<vmem>>, vector<3x192xf32>
    tpu.vector_store %arg6[%c6, %c0_5], %6 {strides = array<i32>} : memref<27x192xf32, #tpu.memory_space<vmem>>, vector<3x192xf32>,
    %8 = vector.extract_strided_slice %1 {offsets = [0, 16], sizes = [3, 192], strides = [1, 1]} : vector<3x256xf32> to vector<3x192xf32>
    %c9 = arith.constant 9 : index
    %c0_6 = arith.constant 0 : index
    %9 = vector.load %arg6[%c9, %c0_6] : memref<27x192xf32, #tpu.memory_space<vmem>>, vector<3x192xf32>
    tpu.vector_store %arg6[%c9, %c0_6], %8 {strides = array<i32>} : memref<27x192xf32, #tpu.memory_space<vmem>>, vector<3x192xf32>,
    %10 = vector.extract_strided_slice %1 {offsets = [0, 17], sizes = [3, 192], strides = [1, 1]} : vector<3x256xf32> to vector<3x192xf32>
    %c12 = arith.constant 12 : index
    %c0_7 = arith.constant 0 : index
    %11 = vector.load %arg6[%c12, %c0_7] : memref<27x192xf32, #tpu.memory_space<vmem>>, vector<3x192xf32>
    tpu.vector_store %arg6[%c12, %c0_7], %10 {strides = array<i32>} : memref<27x192xf32, #tpu.memory_space<vmem>>, vector<3x192xf32>,
    %12 = vector.extract_strided_slice %1 {offsets = [0, 18], sizes = [3, 192], strides = [1, 1]} : vector<3x256xf32> to vector<3x192xf32>
    %c15 = arith.constant 15 : index
    %c0_8 = arith.constant 0 : index
    %13 = vector.load %arg6[%c15, %c0_8] : memref<27x192xf32, #tpu.memory_space<vmem>>, vector<3x192xf32>
    tpu.vector_store %arg6[%c15, %c0_8], %12 {strides = array<i32>} : memref<27x192xf32, #tpu.memory_space<vmem>>, vector<3x192xf32>,
    %14 = vector.extract_strided_slice %1 {offsets = [0, 32], sizes = [3, 192], strides = [1, 1]} : vector<3x256xf32> to vector<3x192xf32>
    %c18 = arith.constant 18 : index
    %c0_9 = arith.constant 0 : index
    %15 = vector.load %arg6[%c18, %c0_9] : memref<27x192xf32, #tpu.memory_space<vmem>>, vector<3x192xf32>
    tpu.vector_store %arg6[%c18, %c0_9], %14 {strides = array<i32>} : memref<27x192xf32, #tpu.memory_space<vmem>>, vector<3x192xf32>,
    %16 = vector.extract_strided_slice %1 {offsets = [0, 33], sizes = [3, 192], strides = [1, 1]} : vector<3x256xf32> to vector<3x192xf32>
    %c21 = arith.constant 21 : index
    %c0_10 = arith.constant 0 : index
    %17 = vector.load %arg6[%c21, %c0_10] : memref<27x192xf32, #tpu.memory_space<vmem>>, vector<3x192xf32>
    tpu.vector_store %arg6[%c21, %c0_10], %16 {strides = array<i32>} : memref<27x192xf32, #tpu.memory_space<vmem>>, vector<3x192xf32>,
    %18 = vector.extract_strided_slice %1 {offsets = [0, 34], sizes = [3, 192], strides = [1, 1]} : vector<3x256xf32> to vector<3x192xf32>
    %c24 = arith.constant 24 : index
    %c0_11 = arith.constant 0 : index
    %19 = vector.load %arg6[%c24, %c0_11] : memref<27x192xf32, #tpu.memory_space<vmem>>, vector<3x192xf32>
    tpu.vector_store %arg6[%c24, %c0_11], %18 {strides = array<i32>} : memref<27x192xf32, #tpu.memory_space<vmem>>, vector<3x192xf32>,
    %c0_12 = arith.constant 0 : index
    %c0_13 = arith.constant 0 : index
    %20 = vector.load %arg3[%c0_12, %c0_13] : memref<16x183xf32, #tpu.memory_space<vmem>>, vector<6x27xf32>
    %c0_14 = arith.constant 0 : index
    %c0_15 = arith.constant 0 : index
    %21 = vector.load %arg6[%c0_14, %c0_15] : memref<27x192xf32, #tpu.memory_space<vmem>>, vector<27x192xf32>
    %cst = arith.constant dense<0.000000e+00> : vector<6x192xf32>
    %22 = tpu.matmul %20, %21, %cst {dimension_numbers = #tpu.dot_dimension_numbers<[1], [0], [0], [1], [0, 0, 1, 1], [], []>} : vector<6x27xf32>, vector<27x192xf32>, vector<6x192xf32> -> vector<6x192xf32>
    %c0_16 = arith.constant 0 : index
    %c27 = arith.constant 27 : index
    %23 = vector.load %arg3[%c0_16, %c27] : memref<16x183xf32, #tpu.memory_space<vmem>>, vector<6x1xf32>
    %24 = vector.broadcast %23 : vector<6x1xf32> to vector<6x192xf32>
    %25 = arith.addf %22, %24 : vector<6x192xf32>
    %cst_17 = arith.constant 0.000000e+00 : f32
    %26 = vector.broadcast %cst_17 : f32 to vector<6x192xf32>
    %27 = arith.cmpf ogt, %25, %26 : vector<6x192xf32>
    %cst_18 = arith.constant 0.00999999977 : f32
    %28 = vector.broadcast %cst_18 : f32 to vector<6x192xf32>
    %29 = arith.mulf %28, %25 : vector<6x192xf32>
    %30 = arith.select %27, %25, %29 : vector<6x192xi1>, vector<6x192xf32>
    %31 = vector.extract_strided_slice %30 {offsets = [0, 0], sizes = [6, 172], strides = [1, 1]} : vector<6x192xf32> to vector<6x172xf32>
    %32 = vector.extract_strided_slice %30 {offsets = [0, 1], sizes = [6, 172], strides = [1, 1]} : vector<6x192xf32> to vector<6x172xf32>
    %33 = arith.maximumf %31, %32 : vector<6x172xf32>
    %34 = vector.extract_strided_slice %30 {offsets = [0, 16], sizes = [6, 172], strides = [1, 1]} : vector<6x192xf32> to vector<6x172xf32>
    %35 = vector.extract_strided_slice %30 {offsets = [0, 17], sizes = [6, 172], strides = [1, 1]} : vector<6x192xf32> to vector<6x172xf32>
    %36 = arith.maximumf %34, %35 : vector<6x172xf32>
    %37 = arith.maximumf %33, %36 : vector<6x172xf32>
    %38 = vector.extract_strided_slice %37 {offsets = [0, 0], sizes = [6, 104], strides = [1, 1]} : vector<6x172xf32> to vector<6x104xf32>
    %c0_19 = arith.constant 0 : index
    %c0_20 = arith.constant 0 : index
    %39 = vector.load %arg7[%c0_19, %c0_20] : memref<54x104xf32, #tpu.memory_space<vmem>>, vector<6x104xf32>
    tpu.vector_store %arg7[%c0_19, %c0_20], %38 {strides = array<i32>} : memref<54x104xf32, #tpu.memory_space<vmem>>, vector<6x104xf32>,
    %40 = vector.extract_strided_slice %37 {offsets = [0, 2], sizes = [6, 104], strides = [1, 1]} : vector<6x172xf32> to vector<6x104xf32>
    %c6_21 = arith.constant 6 : index
    %c0_22 = arith.constant 0 : index
    %41 = vector.load %arg7[%c6_21, %c0_22] : memref<54x104xf32, #tpu.memory_space<vmem>>, vector<6x104xf32>
    tpu.vector_store %arg7[%c6_21, %c0_22], %40 {strides = array<i32>} : memref<54x104xf32, #tpu.memory_space<vmem>>, vector<6x104xf32>,
    %42 = vector.extract_strided_slice %37 {offsets = [0, 4], sizes = [6, 104], strides = [1, 1]} : vector<6x172xf32> to vector<6x104xf32>
    %c12_23 = arith.constant 12 : index
    %c0_24 = arith.constant 0 : index
    %43 = vector.load %arg7[%c12_23, %c0_24] : memref<54x104xf32, #tpu.memory_space<vmem>>, vector<6x104xf32>
    tpu.vector_store %arg7[%c12_23, %c0_24], %42 {strides = array<i32>} : memref<54x104xf32, #tpu.memory_space<vmem>>, vector<6x104xf32>,
    %44 = vector.extract_strided_slice %37 {offsets = [0, 32], sizes = [6, 104], strides = [1, 1]} : vector<6x172xf32> to vector<6x104xf32>
    %c18_25 = arith.constant 18 : index
    %c0_26 = arith.constant 0 : index
    %45 = vector.load %arg7[%c18_25, %c0_26] : memref<54x104xf32, #tpu.memory_space<vmem>>, vector<6x104xf32>
    tpu.vector_store %arg7[%c18_25, %c0_26], %44 {strides = array<i32>} : memref<54x104xf32, #tpu.memory_space<vmem>>, vector<6x104xf32>,
    %46 = vector.extract_strided_slice %37 {offsets = [0, 34], sizes = [6, 104], strides = [1, 1]} : vector<6x172xf32> to vector<6x104xf32>
    %c24_27 = arith.constant 24 : index
    %c0_28 = arith.constant 0 : index
    %47 = vector.load %arg7[%c24_27, %c0_28] : memref<54x104xf32, #tpu.memory_space<vmem>>, vector<6x104xf32>
    tpu.vector_store %arg7[%c24_27, %c0_28], %46 {strides = array<i32>} : memref<54x104xf32, #tpu.memory_space<vmem>>, vector<6x104xf32>,
    %48 = vector.extract_strided_slice %37 {offsets = [0, 36], sizes = [6, 104], strides = [1, 1]} : vector<6x172xf32> to vector<6x104xf32>
    %c30 = arith.constant 30 : index
    %c0_29 = arith.constant 0 : index
    %49 = vector.load %arg7[%c30, %c0_29] : memref<54x104xf32, #tpu.memory_space<vmem>>, vector<6x104xf32>
    tpu.vector_store %arg7[%c30, %c0_29], %48 {strides = array<i32>} : memref<54x104xf32, #tpu.memory_space<vmem>>, vector<6x104xf32>,
    %50 = vector.extract_strided_slice %37 {offsets = [0, 64], sizes = [6, 104], strides = [1, 1]} : vector<6x172xf32> to vector<6x104xf32>
    %c36 = arith.constant 36 : index
    %c0_30 = arith.constant 0 : index
    %51 = vector.load %arg7[%c36, %c0_30] : memref<54x104xf32, #tpu.memory_space<vmem>>, vector<6x104xf32>
    tpu.vector_store %arg7[%c36, %c0_30], %50 {strides = array<i32>} : memref<54x104xf32, #tpu.memory_space<vmem>>, vector<6x104xf32>,
    %52 = vector.extract_strided_slice %37 {offsets = [0, 66], sizes = [6, 104], strides = [1, 1]} : vector<6x172xf32> to vector<6x104xf32>
    %c42 = arith.constant 42 : index
    %c0_31 = arith.constant 0 : index
    %53 = vector.load %arg7[%c42, %c0_31] : memref<54x104xf32, #tpu.memory_space<vmem>>, vector<6x104xf32>
    tpu.vector_store %arg7[%c42, %c0_31], %52 {strides = array<i32>} : memref<54x104xf32, #tpu.memory_space<vmem>>, vector<6x104xf32>,
    %54 = vector.extract_strided_slice %37 {offsets = [0, 68], sizes = [6, 104], strides = [1, 1]} : vector<6x172xf32> to vector<6x104xf32>
    %c48 = arith.constant 48 : index
    %c0_32 = arith.constant 0 : index
    %55 = vector.load %arg7[%c48, %c0_32] : memref<54x104xf32, #tpu.memory_space<vmem>>, vector<6x104xf32>
    tpu.vector_store %arg7[%c48, %c0_32], %54 {strides = array<i32>} : memref<54x104xf32, #tpu.memory_space<vmem>>, vector<6x104xf32>,
    %c0_33 = arith.constant 0 : index
    %c128 = arith.constant 128 : index
    %56 = vector.load %arg3[%c0_33, %c128] : memref<16x183xf32, #tpu.memory_space<vmem>>, vector<16x54xf32>
    %c0_34 = arith.constant 0 : index
    %c0_35 = arith.constant 0 : index
    %57 = vector.load %arg7[%c0_34, %c0_35] : memref<54x104xf32, #tpu.memory_space<vmem>>, vector<54x104xf32>
    %cst_36 = arith.constant dense<0.000000e+00> : vector<16x104xf32>
    %58 = tpu.matmul %56, %57, %cst_36 {dimension_numbers = #tpu.dot_dimension_numbers<[1], [0], [0], [1], [0, 0, 1, 1], [], []>} : vector<16x54xf32>, vector<54x104xf32>, vector<16x104xf32> -> vector<16x104xf32>
    %c0_37 = arith.constant 0 : index
    %c182 = arith.constant 182 : index
    %59 = vector.load %arg3[%c0_37, %c182] : memref<16x183xf32, #tpu.memory_space<vmem>>, vector<16x1xf32>
    %60 = vector.broadcast %59 : vector<16x1xf32> to vector<16x104xf32>
    %61 = arith.addf %58, %60 : vector<16x104xf32>
    %cst_38 = arith.constant 0.000000e+00 : f32
    %62 = vector.broadcast %cst_38 : f32 to vector<16x104xf32>
    %63 = arith.cmpf ogt, %61, %62 : vector<16x104xf32>
    %cst_39 = arith.constant 0.00999999977 : f32
    %64 = vector.broadcast %cst_39 : f32 to vector<16x104xf32>
    %65 = arith.mulf %64, %61 : vector<16x104xf32>
    %66 = arith.select %63, %61, %65 : vector<16x104xi1>, vector<16x104xf32>
    %67 = vector.extract_strided_slice %66 {offsets = [0, 0], sizes = [16, 69], strides = [1, 1]} : vector<16x104xf32> to vector<16x69xf32>
    %68 = vector.extract_strided_slice %66 {offsets = [0, 2], sizes = [16, 69], strides = [1, 1]} : vector<16x104xf32> to vector<16x69xf32>
    %69 = arith.maximumf %67, %68 : vector<16x69xf32>
    %70 = vector.extract_strided_slice %66 {offsets = [0, 32], sizes = [16, 69], strides = [1, 1]} : vector<16x104xf32> to vector<16x69xf32>
    %71 = vector.extract_strided_slice %66 {offsets = [0, 34], sizes = [16, 69], strides = [1, 1]} : vector<16x104xf32> to vector<16x69xf32>
    %72 = arith.maximumf %70, %71 : vector<16x69xf32>
    %73 = arith.maximumf %69, %72 : vector<16x69xf32>
    %74 = vector.extract_strided_slice %73 {offsets = [0, 0], sizes = [16, 1], strides = [1, 1]} : vector<16x69xf32> to vector<16x1xf32>
    %c0_40 = arith.constant 0 : index
    %c0_41 = arith.constant 0 : index
    %75 = vector.load %arg8[%c0_40, %c0_41] : memref<19x4xf32, #tpu.memory_space<vmem>>, vector<16x1xf32>
    tpu.vector_store %arg8[%c0_40, %c0_41], %74 {strides = array<i32>} : memref<19x4xf32, #tpu.memory_space<vmem>>, vector<16x1xf32>,
    %76 = vector.extract_strided_slice %73 {offsets = [0, 4], sizes = [16, 1], strides = [1, 1]} : vector<16x69xf32> to vector<16x1xf32>
    %c0_42 = arith.constant 0 : index
    %c1 = arith.constant 1 : index
    %77 = vector.load %arg8[%c0_42, %c1] : memref<19x4xf32, #tpu.memory_space<vmem>>, vector<16x1xf32>
    tpu.vector_store %arg8[%c0_42, %c1], %76 {strides = array<i32>} : memref<19x4xf32, #tpu.memory_space<vmem>>, vector<16x1xf32>,
    %78 = vector.extract_strided_slice %73 {offsets = [0, 64], sizes = [16, 1], strides = [1, 1]} : vector<16x69xf32> to vector<16x1xf32>
    %c0_43 = arith.constant 0 : index
    %c2 = arith.constant 2 : index
    %79 = vector.load %arg8[%c0_43, %c2] : memref<19x4xf32, #tpu.memory_space<vmem>>, vector<16x1xf32>
    tpu.vector_store %arg8[%c0_43, %c2], %78 {strides = array<i32>} : memref<19x4xf32, #tpu.memory_space<vmem>>, vector<16x1xf32>,
    %80 = vector.extract_strided_slice %73 {offsets = [0, 68], sizes = [16, 1], strides = [1, 1]} : vector<16x69xf32> to vector<16x1xf32>
    %c0_44 = arith.constant 0 : index
    %c3_45 = arith.constant 3 : index
    %81 = vector.load %arg8[%c0_44, %c3_45] : memref<19x4xf32, #tpu.memory_space<vmem>>, vector<16x1xf32>
    tpu.vector_store %arg8[%c0_44, %c3_45], %80 {strides = array<i32>} : memref<19x4xf32, #tpu.memory_space<vmem>>, vector<16x1xf32>,
    %c0_46 = arith.constant 0 : index
    %c0_47 = arith.constant 0 : index
    %c0_48 = arith.constant 0 : index
    %82 = vector.load %arg2[%c0_46, %c0_47, %c0_48] : memref<1x3x4xf32, #tpu.memory_space<vmem>>, vector<1x3x4xf32>
    %83 = vector.shape_cast %82 : vector<1x3x4xf32> to vector<3x4xf32>
    %c16 = arith.constant 16 : index
    %c0_49 = arith.constant 0 : index
    %84 = vector.load %arg8[%c16, %c0_49] : memref<19x4xf32, #tpu.memory_space<vmem>>, vector<3x4xf32>
    tpu.vector_store %arg8[%c16, %c0_49], %83 {strides = array<i32>} : memref<19x4xf32, #tpu.memory_space<vmem>>, vector<3x4xf32>,
    %c0_50 = arith.constant 0 : index
    %c0_51 = arith.constant 0 : index
    %85 = vector.load %arg8[%c0_50, %c0_51] : memref<19x4xf32, #tpu.memory_space<vmem>>, vector<19x4xf32>
    %c0_52 = arith.constant 0 : index
    %c128_53 = arith.constant 128 : index
    %86 = vector.load %arg4[%c0_52, %c128_53] : memref<121x258xf32, #tpu.memory_space<vmem>>, vector<4x120xf32>
    %cst_54 = arith.constant dense<0.000000e+00> : vector<19x120xf32>
    %87 = tpu.matmul %85, %86, %cst_54 {dimension_numbers = #tpu.dot_dimension_numbers<[1], [0], [0], [1], [0, 0, 1, 1], [], []>} : vector<19x4xf32>, vector<4x120xf32>, vector<19x120xf32> -> vector<19x120xf32>
    %c4 = arith.constant 4 : index
    %c128_55 = arith.constant 128 : index
    %88 = vector.load %arg4[%c4, %c128_55] : memref<121x258xf32, #tpu.memory_space<vmem>>, vector<1x120xf32>
    %89 = vector.broadcast %88 : vector<1x120xf32> to vector<19x120xf32>
    %90 = arith.addf %87, %89 : vector<19x120xf32>
    %cst_56 = arith.constant 0.000000e+00 : f32
    %91 = vector.broadcast %cst_56 : f32 to vector<19x120xf32>
    %92 = arith.maximumf %90, %91 : vector<19x120xf32>
    %c0_57 = arith.constant 0 : index
    %c0_58 = arith.constant 0 : index
    %93 = vector.load %arg4[%c0_57, %c0_58] : memref<121x258xf32, #tpu.memory_space<vmem>>, vector<120x84xf32>
    %cst_59 = arith.constant dense<0.000000e+00> : vector<19x84xf32>
    %94 = tpu.matmul %92, %93, %cst_59 {dimension_numbers = #tpu.dot_dimension_numbers<[1], [0], [0], [1], [0, 0, 1, 1], [], []>} : vector<19x120xf32>, vector<120x84xf32>, vector<19x84xf32> -> vector<19x84xf32>
    %c120 = arith.constant 120 : index
    %c0_60 = arith.constant 0 : index
    %95 = vector.load %arg4[%c120, %c0_60] : memref<121x258xf32, #tpu.memory_space<vmem>>, vector<1x84xf32>
    %96 = vector.broadcast %95 : vector<1x84xf32> to vector<19x84xf32>
    %97 = arith.addf %94, %96 : vector<19x84xf32>
    %cst_61 = arith.constant 0.000000e+00 : f32
    %98 = vector.broadcast %cst_61 : f32 to vector<19x84xf32>
    %99 = arith.maximumf %97, %98 : vector<19x84xf32>
    %c0_62 = arith.constant 0 : index
    %c256 = arith.constant 256 : index
    %100 = vector.load %arg4[%c0_62, %c256] : memref<121x258xf32, #tpu.memory_space<vmem>>, vector<84x2xf32>
    %cst_63 = arith.constant dense<0.000000e+00> : vector<19x2xf32>
    %101 = tpu.matmul %99, %100, %cst_63 {dimension_numbers = #tpu.dot_dimension_numbers<[1], [0], [0], [1], [0, 0, 1, 1], [], []>} : vector<19x84xf32>, vector<84x2xf32>, vector<19x2xf32> -> vector<19x2xf32>
    %c84 = arith.constant 84 : index
    %c256_64 = arith.constant 256 : index
    %102 = vector.load %arg4[%c84, %c256_64] : memref<121x258xf32, #tpu.memory_space<vmem>>, vector<1x2xf32>
    %103 = vector.broadcast %102 : vector<1x2xf32> to vector<19x2xf32>
    %104 = arith.addf %101, %103 : vector<19x2xf32>
    %c0_65 = arith.constant 0 : index
    %c0_66 = arith.constant 0 : index
    %c0_67 = arith.constant 0 : index
    %105 = vector.load %arg5[%c0_65, %c0_66, %c0_67] : memref<1x19x2xf32, #tpu.memory_space<vmem>>, vector<1x19x2xf32>
    %106 = vector.shape_cast %105 : vector<1x19x2xf32> to vector<19x2xf32>
    %107 = vector.shape_cast %104 : vector<19x2xf32> to vector<1x19x2xf32>
    tpu.vector_store %arg5[%c0_65, %c0_66, %c0_67], %107 {strides = array<i32>} : memref<1x19x2xf32, #tpu.memory_space<vmem>>, vector<1x19x2xf32>,
    return
  }
  func.func @transform_0(%arg0: i32) -> (i32, i32, i32) {
    %c0_i32 = arith.constant 0 : i32
    %c0_i32_0 = arith.constant 0 : i32
    %c0_i32_1 = arith.constant 0 : i32
    return %arg0, %c0_i32, %c0_i32_0 : i32, i32, i32
  }
  func.func @transform_1(%arg0: i32) -> (i32, i32, i32) {
    %c0_i32 = arith.constant 0 : i32
    %c0_i32_0 = arith.constant 0 : i32
    %c0_i32_1 = arith.constant 0 : i32
    return %arg0, %c0_i32, %c0_i32_0 : i32, i32, i32
  }
  func.func @transform_2(%arg0: i32) -> (i32, i32) {
    %c0_i32 = arith.constant 0 : i32
    %c0_i32_0 = arith.constant 0 : i32
    %c0_i32_1 = arith.constant 0 : i32
    return %c0_i32, %c0_i32_0 : i32, i32
  }
  func.func @transform_3(%arg0: i32) -> (i32, i32) {
    %c0_i32 = arith.constant 0 : i32
    %c0_i32_0 = arith.constant 0 : i32
    %c0_i32_1 = arith.constant 0 : i32
    return %c0_i32, %c0_i32_0 : i32, i32
  }
  func.func @transform_4(%arg0: i32) -> (i32, i32, i32) {
    %c0_i32 = arith.constant 0 : i32
    %c0_i32_0 = arith.constant 0 : i32
    %c0_i32_1 = arith.constant 0 : i32
    return %arg0, %c0_i32, %c0_i32_0 : i32, i32, i32
  }
}

</mosaic_0001>

<bundles_post_ra>
// kernel: convnet_forward.1
= control target key start
LH: loop header
LB: loop body
LE: loop exit
PB: predicated region body
PF: predicated region fallthrough
CT: control target
= control target key end

     0   :  { %s1382_s15 = smov 0   ;;  %s1592_s0 = inlined_call_operand.vmem [shape: f32[4,3,256], index: 0, kind: input, shape index: {}]   ;;  %s1593_s1 = inlined_call_operand.vmem [shape: f32[4,3,4], index: 1, kind: input, shape index: {}]   ;;  %s1594_s2 = inlined_call_operand.vmem [shape: f32[16,183], index: 2, kind: input, shape index: {}]   ;;  %s1595_s3 = inlined_call_operand.vmem [shape: f32[121,258], index: 3, kind: input, shape index: {}]   ;;  %s1596_s4 = inlined_call_operand.vmem [shape: f32[4,19,2], index: 4, kind: output, shape index: {}]  }
   0x1 LB: > { %s1061_s16 = sadd.s32 4294967295, %s1333_s15   ;;  %p1065_p0 = scmp.ge.s32.totalorder %s1333_s15, 1  ;;  %s1333_s15 = sphi %s1382_s15, %s14_s15  }
   0x2   : > { %p171_p1 = scmp.lt.s32.totalorder %s1333_s15, 5 }
   0x4   : > { %p172_p2 = pnand %p1065_p0, %p171_p1 }
   0x5   : > { %p201_p3 = scmp.lt.s32.totalorder (!%p172_p2), %s1061_s16, 3  ;;  %vm220_vm0 = vcmask (!%p172_p2), 518144   ;;  %s1335_s21 = smov (!%p172_p2), 126   ;;  %v1342_v15 = vmov (!%p172_p2), 0.0   ;;  %v1344_v16 = vmov (!%p172_p2), 27   ;;  %vm241_vm1 = vcmask (!%p172_p2), 1031168  }
   0x6   : > { %175 = sbr.rel (%p172_p2) target bundleno = 2020 (0x7e4), region = 36  ;;  %s1336_s22 = smov (!%p172_p2), 127   ;;  %416 = vmatprep.mubr.f32.mxu0 (!%p172_p2), %v1342_v15  ;;  %1322 = vset.pattern.permute.xlu0 (!%p172_p2), %v1344_v16  ;;  %v1411_v17 = vld [vmem:[%s1594_s2] sm:$0x3f] (!%p172_p2)  ;;  %vm246_vm2 = vcmask (!%p172_p2), 523270   ;;  %vm249_vm3 = vcmask (!%p172_p2), 516096  }
   0x7   : > { %s1337_s23 = smov (!%p172_p2), 112   ;;  %s1338_s24 = smov (!%p172_p2), 111   ;;  %vm257_vm4 = vcmask (!%p172_p2), 916480   ;;  %vm262_vm5 = vcmask (!%p172_p2), 519169   ;;  %vm228_vm6 = vcmask (!%p172_p2), 1039360   ;;  %vm233_vm7 = vcmask (!%p172_p2), 521219  }
   0x8   : > { %s1339_s25 = smov (!%p172_p2), 110   ;;  %s1340_s26 = smov (!%p172_p2), 96   ;;  %vm274_vm8 = vcmask (!%p172_p2), 522244   ;;  %vm269_vm9 = vcmask (!%p172_p2), 908288   ;;  %vm287_vm10 = vcmask (!%p172_p2), 523271   ;;  %vm290_vm11 = vcmask (!%p172_p2), 517120  }
   0x9   : > { %s1341_s27 = smov (!%p172_p2), 95   ;;  %s1343_s28 = smov (!%p172_p2), 94   ;;  %vm282_vm12 = vcmask (!%p172_p2), 900096   ;;  %vm303_vm13 = vcmask (!%p172_p2), 520194   ;;  %vm298_vm14 = vcmask (!%p172_p2), 785408   ;;  %vm316_vm15 = vcmask (!%p172_p2), 523269  }
   0xa   : > { %s1346_s5 = smov (!%p172_p2), 92   ;;  %s1347_s6 = smov (!%p172_p2), 124  }
   0xb   : > { %s1348_s7 = smov (!%p172_p2), 64   ;;  %s1349_s8 = smov (!%p172_p2), 62  }
   0xc   : > { %s1350_s9 = smov (!%p172_p2), 60  }
   0xd   : > { %s1598_s16 = smov (!%p201_p3, %s1061_s16), 3 }
   0xe   : > { %s1089_s17 = sshll.u32 %s1598_s16, 3  ;;  %s1068_s18 = sshll.u32 %s1598_s16, 2 }
   0xf   : > { %s205_s20 = scalar_lea.vmem %s1592_s0, %s1089_s17 }
  0x10   : > { %v215_v0 = vld [vmem:[%s205_s20] sm:$0x77] }
  0x11   : > { %v235_v1 = vrot.slane %v215_v0, 2  ;;  %219 = vst [vmem:[#allocation2] sm:$0x7] %v215_v0  ;;  %v222_v2 = vrot.slane %v215_v0, 5  ;;  %v217_v3 = vcombine.high %v215_v0, %v215_v0  ;;  %v251_v4 = vrot.slane %v215_v0, 7 }
  0x12   : > { %v264_v8 = vcombine.low %v215_v0, %v215_v0  ;;  %v276_v10 = vrot.slane %v215_v0, 1  ;;  %v292_v12 = vrot.slane %v215_v0, 6  ;;  %v305_v14 = vrot.slane %v215_v0, 3 }
  0x13   : > { %237 = vrot.lane.b32.xlu1 %v235_v1, %s1335_s21  ;;  %224 = vrot.lane.b32.xlu0 %v222_v2, %s1336_s22  ;;  %v236_v5 = vrot.slane %v217_v3, 2  ;;  %221 = vst.msk [vmem:[#allocation2 + $0x8] sm:$0x7] %vm220_vm0, %v217_v3  ;;  %v252_v6 = vrot.slane %v217_v3, 7  ;;  %v223_v7 = vrot.slane %v217_v3, 5  ;;  %v277_v9 = vrot.slane %v217_v3, 1 }
  0x14   : > { %v293_v11 = vrot.slane %v217_v3, 6  ;;  %v306_v13 = vrot.slane %v217_v3, 3 }
  0x17   : > { %253 = vrot.lane.b32.xlu0 %v251_v4, %s1337_s23  ;;  %239 = vrot.lane.b32.xlu1 %v236_v5, %s1335_s21 }
  0x1b   : > { %255 = vrot.lane.b32.xlu1 %v252_v6, %s1337_s23  ;;  %226 = vrot.lane.b32.xlu0 %v223_v7, %s1336_s22 }
  0x1f   : > { %267 = vrot.lane.b32.xlu1 %v215_v0, %s1338_s24  ;;  %265 = vrot.lane.b32.xlu0 %v264_v8, %s1338_s24  ;;  %s1355_s24 = smov 63  }
  0x23   : > { %280 = vrot.lane.b32.xlu1 %v277_v9, %s1339_s25  ;;  %278 = vrot.lane.b32.xlu0 %v276_v10, %s1339_s25  ;;  %v509_v9 = vld [vmem:[%s1594_s2 + $0x8] sm:$0xff]  ;;  %v510_v10 = vld [vmem:[%s1594_s2 + $0x18] sm:$0xff] }
  0x27   : > { %296 = vrot.lane.b32.xlu1 %v293_v11, %s1340_s26  ;;  %294 = vrot.lane.b32.xlu0 %v292_v12, %s1340_s26  ;;  %v1351_v11 = vmov 54  }
  0x28   : > { %1324 = vset.pattern.permute.xlu1 %v1351_v11 }
  0x2b   : > { %309 = vrot.lane.b32.xlu1 %v306_v13, %s1341_s27  ;;  %307 = vrot.lane.b32.xlu0 %v305_v14, %s1341_s27 }
  0x2f   : > { %320 = vrot.lane.b32.xlu1 %v217_v3, %s1343_s28  ;;  %318 = vrot.lane.b32.xlu0 %v215_v0, %s1343_s28 }
  0x33   : > { %339 = vperm.xlu0 %1322, %v1411_v17  }
  0x37   : > { %1323 = vset.pattern.permute.xlu0 %v1351_v11 }
  0x85   : > { %v238_v18 = vpop.permute.xlu1 %237  ;;  %v225_v19 = vpop.permute.xlu0 %224 }
  0x89   : > { %v254_v20 = vpop.permute.xlu0 %253  ;;  %v240_v21 = vpop.permute.xlu1 %239 }
  0x8a   : > { %v242_v22 = vsel %vm241_vm1, %v238_v18, %v240_v21  ;;  %247 = vst.msk [vmem:[#allocation2 + $0x8] sm:$0xc0] %vm246_vm2, %v240_v21  ;;  %vm311_vm1 = vcmask 777216   ;;  %vm322_vm2 = vcmask 769024  }
  0x8b   : > { %250 = vst.msk [vmem:[#allocation2 + $0x18] sm:$0x1] %vm249_vm3, %v240_v21  ;;  %245 = vst [vmem:[#allocation2 + $0x10] ss:$-12 sps:$4 sm:$0xc1] %v242_v22   ;;  %vm345_vm3 = vcmask 1042432  }
  0x8d   : > { %v256_v23 = vpop.permute.xlu1 %255  ;;  %v227_v24 = vpop.permute.xlu0 %226 }
  0x8e   : > { %v258_v25 = vsel %vm257_vm4, %v254_v20, %v256_v23  ;;  %263 = vst.msk [vmem:[#allocation2 + $0x18] sm:$0xe] %vm262_vm5, %v256_v23  ;;  %v229_v26 = vsel %vm228_vm6, %v225_v19, %v227_v24  ;;  %vm1345_vm5 = vmmov 1  }
  0x8f   : > { %234 = vst.msk [vmem:[#allocation2 + $0x8] sm:$0x38] %vm233_vm7, %v227_v24  ;;  %261 = vst [vmem:[#allocation2 + $0x10] sm:$0xe] %v258_v25 }
  0x90   : > { %232 = vst [vmem:[#allocation2] sm:$0x38] %v229_v26  ;;  %vm1238_vm7 = vmpackc.low %vm345_vm3, %vm1345_vm5  ;;  %vm688_vm3 = vcmask 1043456   ;;  %vm1352_vm5 = vmmov 0  }
  0x91   : > { %v268_v27 = vpop.permute.xlu1 %267  ;;  %v266_v28 = vpop.permute.xlu0 %265 }
  0x92   : > { %275 = vst.msk [vmem:[#allocation2 + $0x18] sm:$0x70] %vm274_vm8, %v268_v27  ;;  %v270_v29 = vsel %vm269_vm9, %v266_v28, %v268_v27  ;;  %vm342_vm8 = vcmask 220160  }
  0x93   : > { %273 = vst [vmem:[#allocation2 + $0x10] sm:$0x70] %v270_v29 }
  0x95   : > { %v281_v30 = vpop.permute.xlu1 %280  ;;  %v279_v31 = vpop.permute.xlu0 %278 }
  0x96   : > { %288 = vst.msk [vmem:[#allocation2 + $0x18] sm:$0x80] %vm287_vm10, %v281_v30  ;;  %v283_v32 = vsel %vm282_vm12, %v279_v31, %v281_v30  ;;  %v330_v38 = vld [vmem:[#allocation2 + $0x8] sm:$0xff]  ;;  %vm451_vm10 = vcmask 848896   ;;  %vm497_vm12 = vcmask 506880  }
  0x97   : > { %291 = vst.msk [vmem:[#allocation2 + $0x28] sm:$0x3] %vm290_vm11, %v281_v30  ;;  %286 = vst [vmem:[#allocation2 + $0x20] ss:$-12 sps:$4 sm:$0x83] %v283_v32   ;;  %v329_v42 = vld [vmem:[#allocation2] sm:$0xff] }
  0x98   : > { %vm489_vm11 = vcmask 523264  }
  0x99   : > { %v297_v33 = vpop.permute.xlu1 %296  ;;  %v295_v34 = vpop.permute.xlu0 %294 }
  0x9a   : > { %304 = vst.msk [vmem:[#allocation2 + $0x28] sm:$0x1c] %vm303_vm13, %v297_v33  ;;  %v299_v35 = vsel %vm298_vm14, %v295_v34, %v297_v33  ;;  %vm505_vm13 = vcmask 490496  }
  0x9b   : > { %302 = vst [vmem:[#allocation2 + $0x20] sm:$0x1c] %v299_v35 }
  0x9d   : > { %v310_v36 = vpop.permute.xlu1 %309  ;;  %v308_v37 = vpop.permute.xlu0 %307  ;;  %v332_v39 = vld [vmem:[#allocation2 + $0x18] sm:$0xff] }
  0x9e   : > { %317 = vst.msk [vmem:[#allocation2 + $0x28] sm:$0xe0] %vm316_vm15, %v310_v36  ;;  %v312_v40 = vsel %vm311_vm1, %v308_v37, %v310_v36  ;;  %v1233_v41 = vpack.c.bf16 %v332_v39, %v330_v38  ;;  %v331_v43 = vld [vmem:[#allocation2 + $0x10] sm:$0xff] }
  0x9f   : > { %315 = vst [vmem:[#allocation2 + $0x20] sm:$0xe0] %v312_v40  ;;  %v1235_v44 = vpack.c.bf16 %v331_v43, %v329_v42 }
  0xa0   : > { %1234 = vmatprep.subr.bf16.mxu0 %v1233_v41 }
  0xa1   : > { %v321_v45 = vpop.permute.xlu1 %320  ;;  %v319_v46 = vpop.permute.xlu0 %318  ;;  %1236 = vmatpush1.bf16.msra.mxu0 %v1235_v44 }
  0xa2   : > { %327 = vst.msk [vmem:[#allocation2 + $0x38] sm:$0x7] %vm220_vm0, %v321_v45  ;;  %v323_v47 = vsel %vm322_vm2, %v319_v46, %v321_v45 }
  0xa3   : > { %326 = vst [vmem:[#allocation2 + $0x30] sm:$0x7] %v323_v47 }
  0xa5   : > { %v334_v48 = vld [vmem:[#allocation2 + $0x28] sm:$0xff] }
  0xa6   : > { %v333_v51 = vld [vmem:[#allocation2 + $0x20] sm:$0xff] }
  0xa9   : > { %v336_v49 = vld [vmem:[#allocation2 + $0x38] sm:$0x7] }
  0xaa   : > { %v1237_v50 = vpack.c.bf16 %v336_v49, %v334_v48  ;;  %v335_v52 = vld [vmem:[#allocation2 + $0x30] sm:$0x7] }
  0xab   : > { %v1240_v53 = vpack.c.bf16 %v335_v52, %v333_v51 }
  0xac   : > { %1239 = vmatprep.subr.msk.bf16.mxu0 %vm1238_vm7, %v1237_v50 }
  0xad   : > { %1242 = vmatpush1.bf16.msk.msra.mxu0 %vm1238_vm7, %v1240_v53  ;;  %vm671_vm7 = vcmask 26624  }
  0xb0   : > { %1072 = vmatmul.mubr.msk.f32.vlgmr.msra.gmra.mrb[0].mxu0 %vm342_vm8, %v1411_v17  ;;  %vm649_vm8 = vcmask 15368  }
  0xb1   : > { %1193 = vmatprep.mubr.msk.f32.mxu0 %vm1352_vm5, %v1342_v15 }
  0xb2   : > { %v340_v54 = vpop.permute.xlu0 %339 }
 0x183   : > { %v418_v55 = vpop.f32.mrb[0].mxu0 }
 0x184   : > { %v419_v56 = vadd.f32 %v418_v55, %v340_v54  ;;  %v420_v57 = vpop.f32.mrb[1].mxu0 }
 0x185   : > { %v421_v58 = vadd.f32 %v420_v57, %v340_v54 }
 0x186   : > { %v425_v59 = vmul.f32 0.01, %v419_v56  ;;  %vm423_vm0 = vcmp.gt.f32.partialorder %v419_v56, 0.0 }
 0x187   : > { %v426_v60 = vmul.f32 0.01, %v421_v58  ;;  %vm424_vm9 = vcmp.gt.f32.partialorder %v421_v58, 0.0 }
 0x188   : > { %v427_v61 = vsel %vm423_vm0, %v419_v56, %v425_v59  ;;  %vm658_vm0 = vcmask 23568  }
 0x189   : > { %431 = vrot.lane.b32.xlu1 %v427_v61, %s1336_s22  ;;  %v428_v62 = vsel %vm424_vm9, %v421_v58, %v426_v60  ;;  %v676_v58 = vld [vmem:[%s1595_s3 + $0x8] sm:$0xf]  ;;  %vm667_vm9 = vcmask 31768  }
 0x18d   : > { %433 = vrot.lane.b32.xlu1 %v428_v62, %s1336_s22  ;;  %s1353_s22 = smov 66  }
 0x1fb   : > { %v432_v63 = vpop.permute.xlu1 %431 }
 0x1ff   : > { %v434_v0 = vpop.permute.xlu1 %433 }
 0x200   : > { %v435_v1 = vsel %vm228_vm6, %v432_v63, %v434_v0  ;;  %v439_v2 = vmax.f32 %v428_v62, %v434_v0  ;;  %vm481_vm6 = vcmask 752640   ;;  %v775_v63 = vld [vmem:[%s1595_s3] sm:$0xff]  ;;  %v776_v0 = vld [vmem:[%s1595_s3 + $0x18] sm:$0xff] }
 0x201   : > { %v438_v3 = vmax.f32 %v427_v61, %v435_v1  ;;  %v1356_v1 = vmov 0.0|0.0  }
 0x202   : > { %444 = vrot.lane.b32.xlu1 %v439_v2, %s1337_s23  ;;  %1255 = vmatprep.subr.bf16.mxu0 %v1356_v1 }
 0x203   : > { %442 = vrot.lane.b32.xlu0 %v438_v3, %s1337_s23  ;;  %s1354_s23 = smov 125  }
 0x274   : > { %v445_v4 = vpop.permute.xlu1 %444 }
 0x275   : > { %v450_v5 = vmax.f32 %v439_v2, %v445_v4  ;;  %v443_v6 = vpop.permute.xlu0 %442  ;;  %v1256_v2 = vpack.c.bf16 %v776_v0, %v775_v63 }
 0x276   : > { %v446_v7 = vsel %vm257_vm4, %v443_v6, %v445_v4  ;;  %vm528_vm4 = vcmask 441344   ;;  %v778_v4 = vld [vmem:[%s1595_s3 + $0x48] sm:$0xff]  ;;  %v779_v6 = vld [vmem:[%s1595_s3 + $0x60] sm:$0xff] }
 0x277   : > { %v449_v8 = vmax.f32 %v438_v3, %v446_v7  ;;  %465 = vrot.lane.b32.xlu1 %v450_v5, %s1340_s26  ;;  %1149 = vmatprep.mubr.msk.f32.mxu1 %vm528_vm4, %v509_v9  ;;  %v777_v3 = vld [vmem:[%s1595_s3 + $0x30] sm:$0xff]  ;;  %v780_v7 = vld [vmem:[%s1595_s3 + $0x78] sm:$0xff] }
 0x278   : > { %1257 = vmatpush3.bf16.msra.mxu0 %v1256_v2 }
 0x279   : > { %454 = vrot.lane.b32.xlu0 %v449_v8, %s1335_s21  ;;  %452 = vst.msk [vmem:[#allocation3] sm:$0x3f] %vm451_vm10, %v449_v8  ;;  %1258 = vmatprep.subr.bf16.mxu0 %v1356_v1 }
 0x27b   : > { %472 = vrot.lane.b32.xlu1 %v450_v5, %s1343_s28 }
 0x27d   : > { %463 = vrot.lane.b32.xlu0 %v449_v8, %s1340_s26 }
 0x27f   : > { %479 = vrot.lane.b32.xlu1 %v450_v5, %s1346_s5 }
 0x281   : > { %470 = vrot.lane.b32.xlu0 %v449_v8, %s1343_s28 }
 0x283   : > { %458 = vrot.lane.b32.xlu1 %v449_v8, %s1347_s6 }
 0x285   : > { %477 = vrot.lane.b32.xlu0 %v449_v8, %s1346_s5 }
 0x287   : > { %487 = vrot.lane.b32.xlu1 %v450_v5, %s1348_s7 }
 0x289   : > { %485 = vrot.lane.b32.xlu0 %v449_v8, %s1348_s7  ;;  %s1291_s7 = smul.u32 24, %s1598_s16 }
 0x28b   : > { %495 = vrot.lane.b32.xlu1 %v450_v5, %s1349_s8  ;;  %s214_s12 = scalar_lea.vmem %s1596_s4, %s1291_s7 }
 0x28d   : > { %493 = vrot.lane.b32.xlu0 %v449_v8, %s1349_s8 }
 0x28f   : > { %503 = vrot.lane.b32.xlu1 %v450_v5, %s1350_s9  ;;  %v1259_v5 = vpack.c.bf16 %v778_v4, %v777_v3 }
 0x291   : > { %501 = vrot.lane.b32.xlu0 %v449_v8, %s1350_s9  ;;  %1260 = vmatpush3.bf16.msra.mxu0 %v1259_v5  ;;  %v1262_v8 = vpack.c.bf16 %v780_v7, %v779_v6 }
 0x292   : > { %1261 = vmatprep.subr.bf16.mxu0 %v1356_v1 }
 0x293   : > { %525 = vperm.xlu1 %1324, %v510_v10  }
 0x295   : > { %520 = vperm.xlu0 %1323, %v509_v9   ;;  %v781_v9 = vld [vmem:[%s1595_s3 + $0x90] sm:$0xff]  ;;  %1263 = vmatpush3.bf16.msra.mxu0 %v1262_v8 }
 0x296   : > { %1264 = vmatprep.subr.bf16.mxu0 %v1356_v1 }
 0x2e9   : > { %v466_v12 = vpop.permute.xlu1 %465 }
 0x2eb   : > { %v455_v13 = vpop.permute.xlu0 %454 }
 0x2ec   : > { %457 = vst.msk [vmem:[#allocation3 + $0x6] sm:$0x3f] %vm451_vm10, %v455_v13  ;;  %v784_v13 = vld [vmem:[%s1595_s3 + $0xd8] sm:$0xff] }
 0x2ed   : > { %v473_v14 = vpop.permute.xlu1 %472 }
 0x2ef   : > { %v464_v16 = vpop.permute.xlu0 %463 }
 0x2f0   : > { %v467_v17 = vsel %vm298_vm14, %v464_v16, %v466_v12  ;;  %vm533_vm14 = vcmask 1045504   ;;  %v783_v12 = vld [vmem:[%s1595_s3 + $0xc0] sm:$0xff]  ;;  %v785_v16 = vld [vmem:[%s1595_s3 + $0xf0] sm:$0xff] }
 0x2f1   : > { %469 = vst.msk [vmem:[#allocation3 + $0x12] sm:$0x3f] %vm451_vm10, %v467_v17  ;;  %v480_v18 = vpop.permute.xlu1 %479  ;;  %v786_v17 = vld [vmem:[%s1595_s3 + $0x108] sm:$0xff] }
 0x2f3   : > { %v471_v19 = vpop.permute.xlu0 %470  ;;  %v511_v28 = vld [vmem:[#allocation3] sm:$0xff] }
 0x2f4   : > { %v474_v20 = vsel %vm322_vm2, %v471_v19, %v473_v14  ;;  %vm638_vm2 = vcmask 7168   ;;  %v1268_v14 = vpack.c.bf16 %v784_v13, %v783_v12 }
 0x2f5   : > { %476 = vst.msk [vmem:[#allocation3 + $0x18] sm:$0x3f] %vm451_vm10, %v474_v20  ;;  %v459_v21 = vpop.permute.xlu1 %458 }
 0x2f6   : > { %461 = vst.msk [vmem:[#allocation3 + $0xc] sm:$0x3f] %vm451_vm10, %v459_v21 }
 0x2f7   : > { %v478_v22 = vpop.permute.xlu0 %477 }
 0x2f8   : > { %v482_v23 = vsel %vm481_vm6, %v478_v22, %v480_v18  ;;  %v1271_v18 = vpack.c.bf16 %v786_v17, %v785_v16  ;;  %vm896_vm6 = vcmask 687104  }
 0x2f9   : > { %484 = vst.msk [vmem:[#allocation3 + $0x1e] sm:$0x3f] %vm451_vm10, %v482_v23  ;;  %v488_v24 = vpop.permute.xlu1 %487 }
 0x2fb   : > { %v486_v25 = vpop.permute.xlu0 %485 }
 0x2fc   : > { %v490_v26 = vsel %vm489_vm11, %v486_v25, %v488_v24  ;;  %vm989_vm11 = vcmask 15360  }
 0x2fd   : > { %492 = vst.msk [vmem:[#allocation3 + $0x24] sm:$0x3f] %vm451_vm10, %v490_v26  ;;  %v496_v27 = vpop.permute.xlu1 %495  ;;  %v512_v29 = vld [vmem:[#allocation3 + $0x8] sm:$0xff]  ;;  %v513_v33 = vld [vmem:[#allocation3 + $0x10] sm:$0xff] }
 0x2fe   : > { %v1243_v30 = vpack.c.bf16 %v512_v29, %v511_v28  ;;  %v787_v28 = vld [vmem:[%s1595_s3 + $0x120] sm:$0xff]  ;;  %v788_v29 = vld [vmem:[%s1595_s3 + $0x138] sm:$0xff] }
 0x2ff   : > { %v494_v31 = vpop.permute.xlu0 %493 }
 0x300   : > { %v498_v32 = vsel %vm497_vm12, %v494_v31, %v496_v27  ;;  %1244 = vmatprep.subr.bf16.mxu1 %v1243_v30  ;;  %v514_v34 = vld [vmem:[#allocation3 + $0x18] sm:$0xff]  ;;  %v789_v31 = vld [vmem:[%s1595_s3 + $0x150] sm:$0xff]  ;;  %vm992_vm12 = vcmask 10240  }
 0x301   : > { %500 = vst.msk [vmem:[#allocation3 + $0x2a] sm:$0x3f] %vm451_vm10, %v498_v32  ;;  %1246 = vmatpush3.bf16.msra.mxu1 %v1243_v30  ;;  %v1247_v35 = vpack.c.bf16 %v514_v34, %v513_v33  ;;  %v504_v36 = vpop.permute.xlu1 %503  ;;  %v1274_v30 = vpack.c.bf16 %v788_v29, %v787_v28  ;;  %v884_v32 = vld [vmem:[%s1595_s3 + $0x10] sm:$0xff]  ;;  %v885_v33 = vld [vmem:[%s1595_s3 + $0x28] sm:$0xff]  ;;  %v886_v34 = vld [vmem:[%s1595_s3 + $0x40] sm:$0xff] }
 0x303   : > { %v502_v37 = vpop.permute.xlu0 %501  ;;  %1248 = vmatprep.subr.bf16.mxu1 %v1247_v35 }
 0x304   : > { %v506_v38 = vsel %vm505_vm13, %v502_v37, %v504_v36  ;;  %v515_v39 = vld [vmem:[#allocation3 + $0x20] sm:$0xff]  ;;  %v887_v36 = vld [vmem:[%s1595_s3 + $0x58] sm:$0xff] }
 0x305   : > { %508 = vst.msk [vmem:[#allocation3 + $0x30] sm:$0x3f] %vm451_vm10, %v506_v38  ;;  %1250 = vmatpush3.bf16.msra.mxu1 %v1247_v35  ;;  %vm678_vm10 = vcmask 31744   ;;  %v1277_v35 = vpack.c.bf16 %v885_v33, %v884_v32  ;;  %v1280_v37 = vpack.c.bf16 %v887_v36, %v886_v34  ;;  %v888_v38 = vld [vmem:[%s1595_s3 + $0x70] sm:$0xff] }
 0x308   : > { %v516_v40 = vld [vmem:[#allocation3 + $0x28] sm:$0xff] }
 0x309   : > { %v1251_v41 = vpack.c.bf16 %v516_v40, %v515_v39  ;;  %v889_v39 = vld [vmem:[%s1595_s3 + $0x88] sm:$0xff] }
 0x30a   : > { %v1283_v40 = vpack.c.bf16 %v889_v39, %v888_v38 }
 0x30b   : > { %1252 = vmatprep.subr.bf16.mxu1 %v1251_v41 }
 0x30c   : > { %1254 = vmatpush3.bf16.msra.mxu1 %v1251_v41  ;;  %v517_v42 = vld [vmem:[#allocation3 + $0x30] sm:$0x3f]  ;;  %v890_v41 = vld [vmem:[%s1595_s3 + $0xa0] sm:$0xff] }
 0x30d   : > { %1147 = vmatprep.subr.msk.mxu1 %vm533_vm14, %v517_v42 }
 0x310   : > { %1148 = vmatpush3.msk.msra.mxu1 %vm533_vm14, %v517_v42  ;;  %v891_v42 = vld [vmem:[%s1595_s3 + $0xb8] sm:$0xff] }
 0x311   : > { %1150 = vmatmul.mubr.msk.f32.vlgmr.msra.gmra.mrb[0].mxu1 %vm528_vm4, %v510_v10  ;;  %1152 = vmatprep.subr.mxu1 %v1342_v15  ;;  %v782_v10 = vld [vmem:[%s1595_s3 + $0xa8] sm:$0xff]  ;;  %vm791_vm4 = vcmask 982016  }
 0x312   : > { %v526_v43 = vpop.permute.xlu1 %525  ;;  %1153 = vmatpush3.msk.msra.mxu1 %vm688_vm3, %v676_v58  ;;  %1154 = vmatprep.mubr.msk.f32.mxu1 %vm1352_vm5, %v1342_v15  ;;  %v1265_v11 = vpack.c.bf16 %v782_v10, %v781_v9  ;;  %v893_v58 = vld [vmem:[%s1595_s3 + $0xe8] sm:$0xff]  ;;  %v895_v10 = vld [vmem:[%s1595_s3 + $0x104] ss:$0 sm:$0xff] }
 0x313   : > { %1276 = vmatprep.subr.bf16.mxu1 %v1356_v1 }
 0x314   : > { %v521_v44 = vpop.permute.xlu0 %520  ;;  %1266 = vmatpush3.bf16.msra.mxu0 %v1265_v11 }
 0x315   : > { %1267 = vmatprep.subr.bf16.mxu0 %v1356_v1 }
 0x318   : > { %1269 = vmatpush3.bf16.msra.mxu0 %v1268_v14 }
 0x319   : > { %1270 = vmatprep.subr.bf16.mxu0 %v1356_v1 }
 0x31c   : > { %1272 = vmatpush3.bf16.msra.mxu0 %v1271_v18 }
 0x31d   : > { %1273 = vmatprep.subr.bf16.mxu0 %v1356_v1 }
 0x320   : > { %1275 = vmatpush3.bf16.msra.mxu0 %v1274_v30 }
 0x321   : > { %1191 = vmatprep.subr.mxu0 %v1342_v15 }
 0x324   : > { %1192 = vmatpush3.msra.mxu0 %v789_v31 }
 0x3e4   : > { %v1151_v45 = vpop.f32.mrb[0].mxu1 }
 0x3e5   : > { %v609_v46 = vadd.f32 %v1151_v45, %v526_v43  ;;  %v603_v47 = vpop.f32.mrb[1].mxu1  ;;  %v1286_v43 = vpack.c.bf16 %v891_v42, %v890_v41 }
 0x3e6   : > { %v604_v48 = vadd.f32 %v603_v47, %v521_v44  ;;  %v677_v44 = vld [vmem:[%s1595_s3 + $0xc] ss:$0 sm:$0xff] }
 0x3e7   : > { %v615_v49 = vmul.f32 0.01, %v609_v46  ;;  %vm613_vm15 = vcmp.gt.f32.partialorder %v609_v46, 0.0 }
 0x3e8   : > { %v614_v50 = vmul.f32 0.01, %v604_v48  ;;  %vm612_vm1 = vcmp.gt.f32.partialorder %v604_v48, 0.0 }
 0x3e9   : > { %v617_v51 = vsel %vm613_vm15, %v609_v46, %v615_v49 }
 0x3ea   : > { %622 = vrot.lane.b32.xlu0 %v617_v51, %s1335_s21  ;;  %v616_v52 = vsel %vm612_vm1, %v604_v48, %v614_v50 }
 0x3eb   : > { %620 = vrot.lane.b32.xlu1 %v616_v52, %s1335_s21  ;;  %s209_s21 = scalar_lea.vmem %s1593_s1, %s1068_s18 }
 0x3ec   : > { %v670_v62 = vld [vmem:[%s209_s21] sm:$0x7] }
 0x3ed   : > { %672 = vst.msk [vmem:[#allocation4 + $0x10] sm:$0x7] %vm671_vm7, %v670_v62 }
 0x3f4   : > { %v675_v27 = vld [vmem:[#allocation4 + $0x10] sm:$0x7] }
 0x45c   : > { %v623_v53 = vpop.permute.xlu0 %622 }
 0x45d   : > { %v627_v54 = vmax.f32 %v617_v51, %v623_v53  ;;  %v621_v55 = vpop.permute.xlu1 %620 }
 0x45e   : > { %v626_v56 = vmax.f32 %v616_v52, %v621_v55 }
 0x45f   : > { %632 = vrot.lane.b32.xlu0 %v627_v54, %s1340_s26 }
 0x460   : > { %630 = vrot.lane.b32.xlu1 %v626_v56, %s1340_s26 }
 0x4d1   : > { %v633_v57 = vpop.permute.xlu0 %632 }
 0x4d2   : > { %v637_v59 = vmax.f32 %v627_v54, %v633_v57  ;;  %v631_v60 = vpop.permute.xlu1 %630  ;;  %v892_v57 = vld [vmem:[%s1595_s3 + $0xd0] sm:$0xff] }
 0x4d3   : > { %v636_v61 = vmax.f32 %v626_v56, %v631_v60  ;;  %v894_v60 = vld [vmem:[%s1595_s3 + $0x100] sm:$0xf] }
 0x4d4   : > { %640 = vst.msk [vmem:[#allocation4 + $0x8] sm:$0xff] %vm638_vm2, %v637_v59 }
 0x4d5   : > { %652 = vrot.lane.b32.xlu0 %v636_v61, %s1353_s22  ;;  %643 = vrot.lane.b32.xlu1 %v636_v61, %s1354_s23  ;;  %639 = vst.msk [vmem:[#allocation4] sm:$0xff] %vm638_vm2, %v636_v61 }
 0x4d9   : > { %645 = vrot.lane.b32.xlu0 %v637_v59, %s1354_s23  ;;  %661 = vrot.lane.b32.xlu1 %v636_v61, %s1355_s24  ;;  %v790_v61 = vld [vmem:[%s1595_s3 + $0x168] ss:$0 sm:$0xff] }
 0x4dd   : > { %663 = vrot.lane.b32.xlu0 %v637_v59, %s1355_s24  ;;  %654 = vrot.lane.b32.xlu1 %v637_v59, %s1353_s22  ;;  %v1289_v59 = vpack.c.bf16 %v893_v58, %v892_v57 }
 0x547   : > { %v653_v19 = vpop.permute.xlu0 %652  ;;  %v644_v20 = vpop.permute.xlu1 %643 }
 0x548   : > { %650 = vst.msk [vmem:[#allocation4] sm:$0xff] %vm649_vm8, %v644_v20 }
 0x549   : > { %659 = vst.msk [vmem:[#allocation4] sm:$0xff] %vm658_vm0, %v653_v19 }
 0x54b   : > { %v646_v21 = vpop.permute.xlu0 %645  ;;  %v662_v22 = vpop.permute.xlu1 %661 }
 0x54c   : > { %651 = vst.msk [vmem:[#allocation4 + $0x8] sm:$0xff] %vm649_vm8, %v646_v21 }
 0x54d   : > { %668 = vst.msk [vmem:[#allocation4] sm:$0xff] %vm667_vm9, %v662_v22 }
 0x54f   : > { %v664_v23 = vpop.permute.xlu0 %663  ;;  %v655_v24 = vpop.permute.xlu1 %654 }
 0x550   : > { %660 = vst.msk [vmem:[#allocation4 + $0x8] sm:$0xff] %vm658_vm0, %v655_v24 }
 0x551   : > { %669 = vst.msk [vmem:[#allocation4 + $0x8] sm:$0xff] %vm667_vm9, %v664_v23 }
 0x554   : > { %v673_v25 = vld [vmem:[#allocation4] sm:$0xff] }
 0x555   : > { %1155 = vmatmul.mubr.msk.f32.vlgmr.msra.gmra.mrb[2].mxu1 %vm678_vm10, %v673_v25 }
 0x556   : > { %1157 = vmatprep.mubr.msk.f32.mxu1 %vm1352_vm5, %v1342_v15  ;;  %1278 = vmatpush3.bf16.msra.mxu1 %v1277_v35 }
 0x557   : > { %1279 = vmatprep.subr.bf16.mxu1 %v1356_v1 }
 0x558   : > { %v674_v26 = vld [vmem:[#allocation4 + $0x8] sm:$0xff] }
 0x559   : > { %1158 = vmatmul.mubr.msk.f32.gmra.mrb[4].mxu1 %vm678_vm10, %v674_v26 }
 0x55a   : > { %1160 = vmatprep.mubr.msk.f32.mxu1 %vm1352_vm5, %v1342_v15  ;;  %1281 = vmatpush3.bf16.msra.mxu1 %v1280_v37 }
 0x55b   : > { %1282 = vmatprep.subr.bf16.mxu1 %v1356_v1 }
 0x55d   : > { %1161 = vmatmul.mubr.msk.f32.gmra.mrb[6].mxu1 %vm678_vm10, %v675_v27 }
 0x55e   : > { %1224 = vmatprep.mubr.msk.f32.mxu1 %vm1352_vm5, %v1342_v15  ;;  %1284 = vmatpush3.bf16.msra.mxu1 %v1283_v40 }
 0x55f   : > { %1285 = vmatprep.subr.bf16.mxu1 %v1356_v1 }
 0x562   : > { %1287 = vmatpush3.bf16.msra.mxu1 %v1286_v43 }
 0x563   : > { %1288 = vmatprep.subr.bf16.mxu1 %v1356_v1 }
 0x566   : > { %1290 = vmatpush3.bf16.msra.mxu1 %v1289_v59 }
 0x567   : > { %1222 = vmatprep.subr.mxu1 %v1342_v15 }
 0x56a   : > { %1223 = vmatpush3.msk.msra.mxu1 %vm688_vm3, %v894_v60 }
 0x628   : > { %v758_v45 = vpop.f32.mrb[2].mxu1 }
 0x629   : > { %v759_v46 = vadd.f32 %v758_v45, %v677_v44  ;;  %v1156_v47 = vpop.f32.mrb[3].mxu1 }
 0x62b   : > { %v772_v48 = vmax.f32 %v759_v46, 0.0 }
 0x62c   : > { %v763_v49 = vpop.f32.mrb[4].mxu1 }
 0x62d   : > { %1194 = vmatmul.mubr.msk.f32.vlgmr.msra.gmra.mrb[2].mxu0 %vm791_vm4, %v772_v48  ;;  %v764_v50 = vadd.f32 %v763_v49, %v677_v44  ;;  %v1159_v51 = vpop.f32.mrb[5].mxu1 }
 0x62e   : > { %1196 = vmatprep.mubr.msk.f32.mxu0 %vm1352_vm5, %v1342_v15 }
 0x62f   : > { %v773_v52 = vmax.f32 %v764_v50, 0.0 }
 0x630   : > { %v768_v53 = vpop.f32.mrb[6].mxu1 }
 0x631   : > { %v769_v54 = vadd.f32 %v768_v53, %v677_v44  ;;  %v1162_v55 = vpop.f32.mrb[7].mxu1  ;;  %1197 = vmatmul.mubr.msk.f32.gmra.mrb[4].mxu0 %vm791_vm4, %v773_v52 }
 0x632   : > { %1199 = vmatprep.mubr.msk.f32.mxu0 %vm1352_vm5, %v1342_v15 }
 0x633   : > { %v774_v56 = vmax.f32 %v769_v54, 0.0 }
 0x635   : > { %1200 = vmatmul.mubr.msk.f32.gmra.mrb[6].mxu0 %vm791_vm4, %v774_v56 }
 0x700   : > { %v867_v62 = vpop.f32.mrb[2].mxu0 }
 0x701   : > { %v868_v63 = vadd.f32 %v867_v62, %v790_v61  ;;  %v1195_v0 = vpop.f32.mrb[3].mxu0 }
 0x703   : > { %v881_v1 = vmax.f32 %v868_v63, 0.0 }
 0x704   : > { %v872_v2 = vpop.f32.mrb[4].mxu0 }
 0x705   : > { %1225 = vmatmul.mubr.msk.f32.vlgmr.msra.gmra.mrb[8].mxu1 %vm896_vm6, %v881_v1  ;;  %v873_v3 = vadd.f32 %v872_v2, %v790_v61  ;;  %v1198_v4 = vpop.f32.mrb[5].mxu0 }
 0x706   : > { %1227 = vmatprep.mubr.msk.f32.mxu1 %vm1352_vm5, %v1342_v15 }
 0x707   : > { %v882_v5 = vmax.f32 %v873_v3, 0.0 }
 0x708   : > { %v877_v6 = vpop.f32.mrb[6].mxu0 }
 0x709   : > { %v878_v7 = vadd.f32 %v877_v6, %v790_v61  ;;  %v1201_v8 = vpop.f32.mrb[7].mxu0  ;;  %1228 = vmatmul.mubr.msk.f32.gmra.mrb[10].mxu1 %vm896_vm6, %v882_v5 }
 0x70a   : > { %1230 = vmatprep.mubr.msk.f32.mxu1 %vm1352_vm5, %v1342_v15 }
 0x70b   : > { %v883_v9 = vmax.f32 %v878_v7, 0.0 }
 0x70d   : > { %1231 = vmatmul.mubr.msk.f32.gmra.mrb[12].mxu1 %vm896_vm6, %v883_v9 }
 0x7d8   : > { %v975_v11 = vpop.f32.mrb[8].mxu1 }
 0x7d9   : > { %v976_v12 = vadd.f32 %v975_v11, %v895_v10  ;;  %v1226_v13 = vpop.f32.mrb[9].mxu1 }
 0x7db   : > { %990 = vst.msk [vmem:[%s214_s12] sm:$0xff] %vm989_vm11, %v976_v12 }
 0x7dc   : > { %v980_v14 = vpop.f32.mrb[10].mxu1 }
 0x7dd   : > { %v981_v16 = vadd.f32 %v980_v14, %v895_v10  ;;  %v1229_v17 = vpop.f32.mrb[11].mxu1 }
 0x7df   : > { %991 = vst.msk [vmem:[%s214_s12 + $0x8] sm:$0xff] %vm989_vm11, %v981_v16 }
 0x7e0   : > { %v985_v15 = vpop.f32.mrb[12].mxu1 }
 0x7e1   : > { %v986_v18 = vadd.f32 %v985_v15, %v895_v10  ;;  %v1232_v19 = vpop.f32.mrb[13].mxu1 }
 0x7e3   : > { %993 = vst.msk [vmem:[%s214_s12 + $0x10] sm:$0x7] %vm992_vm12, %v986_v18 }
 0x7e4 PF: > { %s14_s15 = sadd.s32 1, %s1333_s15  }
 0x7e5   : > { %p11_p4 = scmp.ge.s32.totalorder %s14_s15, 6  }
 0x7e7   :  { %13 = sbr.rel (!%p11_p4) target bundleno = 1 (0x1), region = 69 }

</bundles_post_ra>
